<compile_context>
chip_gen: v6e
topology: v6e:2x2x1
jax: 0.10.0
libtpu: 0.0.40
codegen_flags: <defaults>
</compile_context>

<pallas_src>
import jax
import jax.numpy as jnp
from jax import lax
from jax.experimental import pallas as pl
from jax.experimental.pallas import tpu as pltpu

NEG = -1e9          # finite "-inf": 0 * NEG == 0 (never NaN) in masked terms
POOL_K = 16
T_PAD = 128         # lane-dense padded tag width
VMEM_LIMIT = 48 * 1024 * 1024   # explicit scoped-VMEM limit (fits v7x's 64 MiB)


# ---------------------------------------------------------------------------
# Kernel 1: dynamic layer fusion + (avg_pool1d folded into) hidden2label
#   layers_ref: (L, tile_n, H) bf16    w_cls_ref: (1, H) f32
#   b_cls_ref:  (1, 1) f32 in SMEM     w_out_ref: (H, T_PAD) bf16 (pool folded)
#   b_out_ref:  (1, T_PAD) f32         out_ref:   (tile_n, T_PAD) f32 lane-dense
# ---------------------------------------------------------------------------
def fused_emission_kernel(layers_ref, w_cls_ref, b_cls_ref, w_out_ref, b_out_ref,
                          out_ref):
    L, tn, H = layers_ref.shape
    x = layers_ref[...].astype(jnp.float32)            # bf16 -> f32 in registers

    # per-layer classifier logit: VPU multiply + lane reduction (XLU),
    # replaces the wasteful 1-column MXU matmul
    w_row = w_cls_ref[...].reshape(1, 1, H)            # (1, 1, H) f32
    col = jnp.sum(x * w_row, axis=-1, keepdims=True) + b_cls_ref[0, 0]   # (L, tn, 1)

    # softmax over the layer axis (f32 on VPU / EUP)
    m = jnp.max(col, axis=0, keepdims=True)            # (1, tn, 1)
    p = jnp.exp(col - m)                                # (L, tn, 1)
    # intentional approximation: EUP reciprocal (weights sum to 1 only ~1e-3)
    inv = pl.reciprocal(jnp.sum(p, axis=0), approx=True)          # (tn, 1)
    fused = jnp.sum((p * inv) * x, axis=0)              # (tn, H) f32

    # avg_pool1d(k=16, s=1) + hidden2label folded into ONE MXU matmul
    out_ref[...] = (
        jnp.dot(fused.astype(jnp.bfloat16), w_out_ref[...],
                preferred_element_type=jnp.float32)
        + b_out_ref[...]
    )                                                    # (tn, T_PAD) lane-dense


def fused_emissions(layers, w_cls_row, b_cls, w_fold, b_fold, *, tile_n=512):
    L, N, H = layers.shape
    t_pad = w_fold.shape[1]
    tile_n = min(tile_n, N)
    assert N % tile_n == 0 and (tile_n == N or tile_n % 8 == 0)
    return pl.pallas_call(
        fused_emission_kernel,
        out_shape=jax.ShapeDtypeStruct((N, t_pad), jnp.float32),
        grid=(N // tile_n,),
        in_specs=[
            pl.BlockSpec((L, tile_n, H), lambda i: (0, i, 0)),
            pl.BlockSpec((1, H), lambda i: (0, 0)),
            pl.BlockSpec(memory_space=pltpu.MemorySpace.SMEM),   # scalar bias
            pl.BlockSpec((H, t_pad), lambda i: (0, 0)),
            pl.BlockSpec((1, t_pad), lambda i: (0, 0)),
        ],
        out_specs=pl.BlockSpec((tile_n, t_pad), lambda i: (i, 0)),
        compiler_params=pltpu.CompilerParams(
            dimension_semantics=("parallel",),
            vmem_limit_bytes=VMEM_LIMIT),
    )(layers, w_cls_row, b_cls, w_fold, b_fold)


# ---------------------------------------------------------------------------
# Kernel 2: CRF negative log-likelihood (torchcrf semantics), per sequence.
#   labels_ref: (tile_b, S) int32      mask_ref:  (tile_b, S) f32
#   em_ref:     (tile_b, S, T_PAD) f32 trans_ref / expt_ref: (T_PAD, T_PAD) f32
#   tmax/start/end: (1, T_PAD) f32     out_ref:   (tile_b, 1) f32  NLL per seq
# exp_trans has its padded columns explicitly zeroed on the host; emissions /
# one-hots are 0 in padded columns, start is NEG there, so padded tags carry
# no probability mass.
# ---------------------------------------------------------------------------
def crf_nll_kernel(labels_ref, mask_ref, em_ref, trans_ref, expt_ref, tmax_ref,
                   start_ref, end_ref, out_ref):
    Bt, S, Tp = em_ref.shape
    labels = labels_ref[...]                            # (Bt, S) int32
    mask = mask_ref[...]                                # (Bt, S) f32
    em = em_ref[...]                                    # (Bt, S, Tp) f32
    trans = trans_ref[...]                              # (Tp, Tp)
    exp_t = expt_ref[...]                               # (Tp, Tp), pad cols zeroed
    tmax = tmax_ref[...]                                # (1, Tp)
    start = start_ref[...]                              # (1, Tp)
    end = end_ref[...]                                  # (1, Tp)

    # gold-tag one-hot generated in-kernel (VPU iota compare) -> no HBM one-hot
    tag_iota = lax.broadcasted_iota(jnp.int32, (Bt, S, Tp), 2)
    oh = (tag_iota == labels[:, :, None]).astype(jnp.float32)

    # ---- numerator (gold-path score): hoisted off the serial recursion -----
    # one matmul for all transition rows; the exact 0/1 one-hot operand makes
    # the result exact up to rounding of the (small) transition values
    rows = jnp.dot(oh.reshape(Bt * S, Tp), trans,
                   preferred_element_type=jnp.float32).reshape(Bt, S, Tp)
    em_sc = jnp.sum(em * oh, axis=-1)                              # (Bt, S)
    end_sc = jnp.sum(oh * end.reshape(1, 1, Tp), axis=-1)          # (Bt, S)
    tr_sc = jnp.sum(rows[:, :S - 1, :] * oh[:, 1:, :], axis=-1)    # (Bt, S-1)
    # torchcrf requires mask[:, 0] == 1 for every sequence (assumed)
    num = (jnp.sum(start * oh[:, 0, :], axis=-1, keepdims=True)
           + em_sc[:, 0:1]
           + jnp.sum((tr_sc + em_sc[:, 1:]) * mask[:, 1:], axis=-1, keepdims=True))
    # end transition at the last valid position (mask is right-padded)
    seq_lens = jnp.sum(mask, axis=-1, keepdims=True)               # (Bt, 1)
    pos = lax.broadcasted_iota(jnp.int32, (Bt, S), 1).astype(jnp.float32)
    last_ind = (pos == (seq_lens - 1.0)).astype(jnp.float32)       # (Bt, S)
    num = num + jnp.sum(last_ind * end_sc, axis=-1, keepdims=True)

    # ---- denominator: stable forward recursion ------------------------------
    def step(e_i, m_i, den):
        mx = jnp.max(den, axis=-1, keepdims=True)                  # (Bt, 1)
        s = jnp.dot(jnp.exp(den - mx), exp_t,
                    preferred_element_type=jnp.float32)            # (Bt, Tp) MXU
        nxt = e_i + mx + tmax + jnp.log(s)
        return jnp.where(m_i > 0.0, nxt, den)

    den = start + em[:, 0, :]                                      # (Bt, Tp)
    if S <= 32:
        # small static S (demo): fully unrolled, static indexing only
        for i in range(1, S):
            den = step(em[:, i, :], mask[:, i:i + 1], den)
    else:
        # realistic S: bounded-unroll loop, per-step ref load of one time step
        pos_i = lax.broadcasted_iota(jnp.int32, (Bt, S), 1)

        def body(i, d):
            e_i = em_ref[:, i, :]                                  # (Bt, Tp)
            m_i = jnp.sum(jnp.where(pos_i == i, mask, 0.0),
                          axis=-1, keepdims=True)                  # (Bt, 1)
            return step(e_i, m_i, d)

        den = lax.fori_loop(1, S, body, den, unroll=8)

    den = den + end
    mx = jnp.max(den, axis=-1, keepdims=True)
    logz = jnp.log(jnp.sum(jnp.exp(den - mx), axis=-1, keepdims=True)) + mx
    out_ref[...] = logz - num                                      # per-seq NLL


def crf_nll_per_seq(labels, mask, em, trans_pad, exp_trans, tmax, start_pad,
                    end_pad, *, tile_b=32):
    B, S, Tp = em.shape
    tile_b = min(tile_b, B)
    assert B % tile_b == 0 and (tile_b == B or tile_b % 8 == 0)
    return pl.pallas_call(
        crf_nll_kernel,
        out_shape=jax.ShapeDtypeStruct((B, 1), jnp.float32),
        grid=(B // tile_b,),
        in_specs=[
            pl.BlockSpec((tile_b, S), lambda b: (b, 0)),           # labels (int32)
            pl.BlockSpec((tile_b, S), lambda b: (b, 0)),           # mask
            pl.BlockSpec((tile_b, S, Tp), lambda b: (b, 0, 0)),    # emissions
            pl.BlockSpec((Tp, Tp), lambda b: (0, 0)),              # transitions
            pl.BlockSpec((Tp, Tp), lambda b: (0, 0)),              # exp(trans - tmax)
            pl.BlockSpec((1, Tp), lambda b: (0, 0)),               # tmax
            pl.BlockSpec((1, Tp), lambda b: (0, 0)),               # start
            pl.BlockSpec((1, Tp), lambda b: (0, 0)),               # end
        ],
        out_specs=pl.BlockSpec((tile_b, 1), lambda b: (b, 0)),
        compiler_params=pltpu.CompilerParams(
            dimension_semantics=("parallel",),
            vmem_limit_bytes=VMEM_LIMIT),
    )(labels, mask, em, trans_pad, exp_trans, tmax, start_pad, end_pad)


# ---------------------------------------------------------------------------
# Host-side (one-time) parameter preparation
# ---------------------------------------------------------------------------
def fold_pool_into_hidden2label(w_h2l, b_h2l, hidden, pool_k, t_pad):
    """Exact linear fold of avg_pool1d(k, stride=1) into the hidden2label weight,
    zero-padded on the tag axis to t_pad lanes."""
    wout, num_tags = w_h2l.shape                    # wout = hidden - pool_k + 1
    i = jnp.arange(hidden)[:, None]
    j = jnp.arange(wout)[None, :]
    p_avg = ((i >= j) & (i < j + pool_k)).astype(jnp.float32) / pool_k   # (H, wout)
    w_fold = p_avg @ w_h2l                                               # (H, T)
    w_pad = jnp.zeros((hidden, t_pad), jnp.float32).at[:, :num_tags].set(w_fold)
    b_pad = jnp.zeros((1, t_pad), jnp.float32).at[:, :num_tags].set(b_h2l)
    return w_pad, b_pad


def pad_crf_params(trans, start_t, end_t, t_pad):
    """Pad CRF params to t_pad lanes and precompute the shifted transition
    exponentials with padded columns EXPLICITLY zeroed (robust padding)."""
    num_tags = trans.shape[0]
    trans_pad = jnp.full((t_pad, t_pad), NEG, jnp.float32).at[:num_tags, :num_tags].set(trans)
    start_pad = jnp.full((1, t_pad), NEG, jnp.float32).at[:, :num_tags].set(start_t)
    end_pad = jnp.zeros((1, t_pad), jnp.float32).at[:, :num_tags].set(end_t)
    tmax = jnp.max(trans_pad, axis=0, keepdims=True)                     # (1, Tp)
    col_valid = jnp.arange(t_pad)[None, :] < num_tags
    exp_trans = jnp.where(col_valid, jnp.exp(trans_pad - tmax), 0.0)     # (Tp, Tp)
    return trans_pad, exp_trans, tmax, start_pad, end_pad


# ---------------------------------------------------------------------------
# Pure-JAX f32 reference (mirrors the PyTorch forward / torchcrf math)
# ---------------------------------------------------------------------------
def reference_forward(encoded_layers, w_cls, b_cls, w_h2l, b_h2l,
                      trans, start_t, end_t, labels, mask, pool_k):
    L, B, S, H = encoded_layers.shape
    layer_logits = jnp.einsum("lbsh,h->bsl", encoded_layers, w_cls[:, 0]) + b_cls[0, 0]
    dist = jax.nn.softmax(layer_logits, axis=-1)
    fused = jnp.einsum("bsl,lbsh->bsh", dist, encoded_layers)
    wout = H - pool_k + 1
    pooled = jnp.stack(
        [fused[..., k:k + pool_k].mean(-1) for k in range(wout)], axis=-1)
    logits = pooled @ w_h2l + b_h2l[0]               # (B, S, T)

    em = logits.transpose(1, 0, 2)                   # (S, B, T)
    tags = labels.T                                  # (S, B)
    msk = mask.T                                     # (S, B)
    Bidx = jnp.arange(B)
    score = start_t[0][tags[0]] + em[0, Bidx, tags[0]]
    for i in range(1, S):
        score = score + (trans[tags[i - 1], tags[i]] + em[i, Bidx, tags[i]]) * msk[i]
    seq_ends = msk.sum(0).astype(jnp.int32) - 1
    last_tags = tags[seq_ends, Bidx]
    score = score + end_t[0][last_tags]
    d = start_t + em[0]
    for i in range(1, S):
        nd = jax.scipy.special.logsumexp(
            d[:, :, None] + trans[None] + em[i][:, None, :], axis=1)
        d = jnp.where(msk[i][:, None] > 0, nd, d)
    d = d + end_t
    logz = jax.scipy.special.logsumexp(d, axis=1)
    return -jnp.sum(score - logz)


if __name__ == "__main__":
    B, S, H, L, T = 2, 8, 32, 4, 9      # batch, seq, bert_hidden, fused layers, tags
    N = B * S

    key = jax.random.PRNGKey(0)
    ks = jax.random.split(key, 8)

    # TODO(synk): the pretrained BERT/NeZha encoder (pre_model) is an external
    # checkpoint; replaced here by deterministic synthetic hidden states.
    encoded_layers = jax.random.normal(ks[0], (L, B, S, H), jnp.float32) * 0.5

    # parameters (deterministic init)
    w_cls = jax.random.normal(ks[1], (H, 1), jnp.float32) * 0.05        # classifier
    b_cls = jnp.zeros((1, 1), jnp.float32)
    w_h2l = jax.random.normal(ks[2], (H - POOL_K + 1, T), jnp.float32) * 0.05
    b_h2l = jnp.zeros((1, T), jnp.float32)
    start_t = jax.random.uniform(ks[3], (1, T), jnp.float32, -0.1, 0.1)  # CRF
    end_t = jax.random.uniform(ks[4], (1, T), jnp.float32, -0.1, 0.1)
    trans = jax.random.uniform(ks[5], (T, T), jnp.float32, -0.1, 0.1)

    # inputs: labels + attention mask (right-padded, mask[:,0]==1 per torchcrf)
    labels = jax.random.randint(ks[6], (B, S), 0, T).astype(jnp.int32)
    lengths = jnp.array([S, S - 3], jnp.int32)
    mask = (jnp.arange(S)[None, :] < lengths[:, None]).astype(jnp.float32)  # (B, S)

    # host-side one-time weight folding / padding / transition exponentials
    w_fold, b_fold = fold_pool_into_hidden2label(w_h2l, b_h2l, H, POOL_K, T_PAD)
    trans_pad, exp_trans, tmax, start_pad, end_pad = pad_crf_params(
        trans, start_t, end_t, T_PAD)

    # encoder hidden states fed to the kernel as bf16 (halved HBM traffic);
    # softmax / fusion / CRF math stays f32 inside the kernels.
    layers_flat = encoded_layers.reshape(L, N, H).astype(jnp.bfloat16)

    # ------------------- forward (training path) -------------------
    # TODO(synk): dropout applied as identity (eval-mode) for determinism.
    logits_pad = fused_emissions(
        layers_flat, jnp.transpose(w_cls), b_cls,
        w_fold.astype(jnp.bfloat16), b_fold, tile_n=512)          # (N, T_PAD)

    em = logits_pad.reshape(B, S, T_PAD)                # free reshape, no transpose
    nll_per_seq = crf_nll_per_seq(labels, mask, em, trans_pad, exp_trans, tmax,
                                  start_pad, end_pad, tile_b=32)  # (B, 1)
    nll = jnp.sum(nll_per_seq)
    jax.block_until_ready(nll)

    nll_ref = reference_forward(encoded_layers, w_cls, b_cls, w_h2l, b_h2l,
                                trans, start_t, end_t, labels, mask, POOL_K)
    # tolerance covers bf16 inputs/matmul operands + EUP approx reciprocal
    assert jnp.allclose(nll, nll_ref, rtol=2e-2, atol=5e-2), (nll, nll_ref)

    print("KERNEL_OK")
</pallas_src>

<mosaic_0001>
module attributes {stable_mosaic.version = 11 : i64} {
  func.func @fused_emission_kernel(%arg0: i32, %arg1: memref<4x16x32xbf16, #tpu.memory_space<vmem>>, %arg2: memref<1x32xf32, #tpu.memory_space<vmem>>, %arg3: memref<1x1xf32, #tpu.memory_space<smem>>, %arg4: memref<32x128xbf16, #tpu.memory_space<vmem>>, %arg5: memref<1x128xf32, #tpu.memory_space<vmem>>, %arg6: memref<16x128xf32, #tpu.memory_space<vmem>>) attributes {dimension_semantics = [#tpu.dimension_semantics<parallel>], iteration_bounds = array<i64: 1>, scalar_prefetch = 0 : i64, scratch_operands = 0 : i64, tpu.core_type = #tpu.core_type<tc>, window_params = [{transform_indices = @transform_0, window_bounds = array<i64: 4, 16, 32>}, {pipeline_mode = #tpu.pipeline_mode<synchronous>, transform_indices = @transform_1, window_bounds = array<i64: 1, 32>}, {transform_indices = @transform_2, window_bounds = array<i64: 1, 1>}, {pipeline_mode = #tpu.pipeline_mode<synchronous>, transform_indices = @transform_3, window_bounds = array<i64: 32, 128>}, {pipeline_mode = #tpu.pipeline_mode<synchronous>, transform_indices = @transform_4, window_bounds = array<i64: 1, 128>}, {transform_indices = @transform_5, window_bounds = array<i64: 16, 128>}]} {
    %c0 = arith.constant 0 : index
    %c0_0 = arith.constant 0 : index
    %c0_1 = arith.constant 0 : index
    %0 = vector.load %arg1[%c0, %c0_0, %c0_1] : memref<4x16x32xbf16, #tpu.memory_space<vmem>>, vector<4x16x32xbf16>
    %1 = arith.extf %0 : vector<4x16x32xbf16> to vector<4x16x32xf32>
    %c0_2 = arith.constant 0 : index
    %c0_3 = arith.constant 0 : index
    %2 = vector.load %arg2[%c0_2, %c0_3] : memref<1x32xf32, #tpu.memory_space<vmem>>, vector<1x32xf32>
    %3 = vector.shape_cast %2 : vector<1x32xf32> to vector<1x1x32xf32>
    %4 = vector.broadcast %3 : vector<1x1x32xf32> to vector<4x16x32xf32>
    %5 = arith.mulf %1, %4 : vector<4x16x32xf32>
    %cst = arith.constant dense<0.000000e+00> : vector<4x16xf32>
    %6 = vector.multi_reduction <add>, %5, %cst [2] : vector<4x16x32xf32> to vector<4x16xf32>
    %7 = vector.shape_cast %6 : vector<4x16xf32> to vector<4x16x1xf32>
    %c0_4 = arith.constant 0 : index
    %c0_5 = arith.constant 0 : index
    %8 = memref.load %arg3[%c0_4, %c0_5] : memref<1x1xf32, #tpu.memory_space<smem>>
    %9 = vector.broadcast %8 : f32 to vector<4x16x1xf32>
    %10 = arith.addf %7, %9 : vector<4x16x1xf32>
    %cst_6 = arith.constant dense<0xFF800000> : vector<16x1xf32>
    %11 = vector.multi_reduction <maximumf>, %10, %cst_6 [0] : vector<4x16x1xf32> to vector<16x1xf32>
    %12 = vector.shape_cast %11 : vector<16x1xf32> to vector<1x16x1xf32>
    %13 = vector.broadcast %12 : vector<1x16x1xf32> to vector<4x16x1xf32>
    %14 = arith.subf %10, %13 : vector<4x16x1xf32>
    %15 = math.exp %14 : vector<4x16x1xf32>
    %cst_7 = arith.constant dense<0.000000e+00> : vector<16x1xf32>
    %16 = vector.multi_reduction <add>, %15, %cst_7 [0] : vector<4x16x1xf32> to vector<16x1xf32>
    %17 = tpu.reciprocal %16 {approx = true} : vector<16x1xf32> -> vector<16x1xf32>
    %18 = vector.shape_cast %17 : vector<16x1xf32> to vector<1x16x1xf32>
    %19 = vector.broadcast %18 : vector<1x16x1xf32> to vector<4x16x1xf32>
    %20 = arith.mulf %15, %19 : vector<4x16x1xf32>
    %21 = vector.broadcast %20 : vector<4x16x1xf32> to vector<4x16x32xf32>
    %22 = arith.mulf %21, %1 : vector<4x16x32xf32>
    %cst_8 = arith.constant dense<0.000000e+00> : vector<16x32xf32>
    %23 = vector.multi_reduction <add>, %22, %cst_8 [0] : vector<4x16x32xf32> to vector<16x32xf32>
    %24 = arith.truncf %23 : vector<16x32xf32> to vector<16x32xbf16>
    %c0_9 = arith.constant 0 : index
    %c0_10 = arith.constant 0 : index
    %25 = vector.load %arg4[%c0_9, %c0_10] : memref<32x128xbf16, #tpu.memory_space<vmem>>, vector<32x128xbf16>
    %cst_11 = arith.constant dense<0.000000e+00> : vector<16x128xf32>
    %26 = tpu.matmul %24, %25, %cst_11 {dimension_numbers = #tpu.dot_dimension_numbers<[1], [0], [0], [1], [0, 0, 1, 1], [], []>} : vector<16x32xbf16>, vector<32x128xbf16>, vector<16x128xf32> -> vector<16x128xf32>
    %c0_12 = arith.constant 0 : index
    %c0_13 = arith.constant 0 : index
    %27 = vector.load %arg5[%c0_12, %c0_13] : memref<1x128xf32, #tpu.memory_space<vmem>>, vector<1x128xf32>
    %28 = vector.broadcast %27 : vector<1x128xf32> to vector<16x128xf32>
    %29 = arith.addf %26, %28 : vector<16x128xf32>
    %c0_14 = arith.constant 0 : index
    %c0_15 = arith.constant 0 : index
    %30 = vector.load %arg6[%c0_14, %c0_15] : memref<16x128xf32, #tpu.memory_space<vmem>>, vector<16x128xf32>
    tpu.vector_store %arg6[%c0_14, %c0_15], %29 {strides = array<i32>} : memref<16x128xf32, #tpu.memory_space<vmem>>, vector<16x128xf32>,
    return
  }
  func.func @transform_0(%arg0: i32) -> (i32, i32, i32) {
    %c0_i32 = arith.constant 0 : i32
    %c0_i32_0 = arith.constant 0 : i32
    %c0_i32_1 = arith.constant 0 : i32
    return %c0_i32, %arg0, %c0_i32_0 : i32, i32, i32
  }
  func.func @transform_1(%arg0: i32) -> (i32, i32) {
    %c0_i32 = arith.constant 0 : i32
    %c0_i32_0 = arith.constant 0 : i32
    %c0_i32_1 = arith.constant 0 : i32
    return %c0_i32, %c0_i32_0 : i32, i32
  }
  func.func @transform_2(%arg0: i32) -> (i32, i32) {
    %c0_i32 = arith.constant 0 : i32
    %c0_i32_0 = arith.constant 0 : i32
    %c0_i32_1 = arith.constant 0 : i32
    return %c0_i32, %c0_i32_0 : i32, i32
  }
  func.func @transform_3(%arg0: i32) -> (i32, i32) {
    %c0_i32 = arith.constant 0 : i32
    %c0_i32_0 = arith.constant 0 : i32
    %c0_i32_1 = arith.constant 0 : i32
    return %c0_i32, %c0_i32_0 : i32, i32
  }
  func.func @transform_4(%arg0: i32) -> (i32, i32) {
    %c0_i32 = arith.constant 0 : i32
    %c0_i32_0 = arith.constant 0 : i32
    %c0_i32_1 = arith.constant 0 : i32
    return %c0_i32, %c0_i32_0 : i32, i32
  }
  func.func @transform_5(%arg0: i32) -> (i32, i32) {
    %c0_i32 = arith.constant 0 : i32
    %c0_i32_0 = arith.constant 0 : i32
    return %arg0, %c0_i32 : i32, i32
  }
}

</mosaic_0001>

<bundles_post_ra>
// kernel: tpu_custom_call.1
= control target key start
LH: loop header
LB: loop body
LE: loop exit
PB: predicated region body
PF: predicated region fallthrough
CT: control target
= control target key end

     0   :  { %11 = vsyncpa [#allocation4], 0  ;;  %s527_s0 = inlined_call_operand.hbm [shape: bf16[4,16,32], index: 0, kind: input, shape index: {}]   ;;  %s528_s1 = inlined_call_operand.vmem [shape: f32[1,32], index: 1, kind: input, shape index: {}]   ;;  %s529_s2 = inlined_call_operand.<no memory space> [shape: f32[1,1], index: 2, kind: input, shape index: {}]   ;;  %s530_s3 = inlined_call_operand.hbm [shape: bf16[32,128], index: 3, kind: input, shape index: {}]   ;;  %s531_s4 = inlined_call_operand.vmem [shape: f32[1,128], index: 4, kind: input, shape index: {}]   ;;  %s532_s5 = inlined_call_operand.hbm [shape: f32[16,128], index: 5, kind: output, shape index: {}]  }
   0x1   :  { %12 = vsyncpa [#allocation7], 0 }
   0x2   :  { %13 = vsyncpa [#allocation5], 0  ;;  %s405_s18 = smov [#allocation3]  }
   0x3   :  { %s19_s19 = sshll.u32 %s405_s18, 4  ;;  %s20_s19 = int_to_ptr.vmem [resolvable:$true] %s19_s19 }
   0x4   :  { %s347_s20 = scalar_lea.vmem %s20_s19, 512  ;;  %p352_p1 = scmp.lt.s32.totalorder %s20_s19, %s20_s19 }
   0x5   :  { %p348_p0 = scmp.ne.s32.totalorder %s20_s19, %s347_s20  ;;  %p353_p2 = scmp.lt.s32.totalorder %s347_s20, %s347_s20 }
   0x7   :  { %p354_p3 = por %p353_p2, %p352_p1 }
   0x9   :  { %p355_p4 = pnand %p354_p3, %p348_p0 }
   0xb   :  { %358 = shalt.err (!%p355_p4)
}
   0xc   :  { %s406_s21 = smov 64   ;;  %s407_s22 = smov 4  }
   0xd   :  { %25 = dma.hbm_to_vmem [thread:$0]  %s527_s0, 512, %s20_s19, [#allocation4], %s406_s21, %s406_s21, %s407_s22  }
   0xe   :  { %s408_s25 = smov [#allocation6]  }
   0xf   :  { %s35_s26 = sshll.u32 %s408_s25, 4  ;;  %s36_s26 = int_to_ptr.vmem [resolvable:$true] %s35_s26 }
  0x10   :  { %s367_s27 = scalar_lea.vmem %s36_s26, 256  ;;  %p372_p6 = scmp.lt.s32.totalorder %s36_s26, %s36_s26 }
  0x11   :  { %p368_p5 = scmp.ne.s32.totalorder %s36_s26, %s367_s27  ;;  %p373_p7 = scmp.lt.s32.totalorder %s367_s27, %s367_s27 }
  0x13   :  { %p374_p8 = por %p373_p7, %p372_p6 }
  0x15   :  { %p375_p9 = pnand %p374_p8, %p368_p5 }
  0x17   :  { %378 = shalt.err (!%p375_p9)
}
  0x18   :  { %41 = dma.hbm_to_vmem [thread:$0]  %s530_s3, 256, %s36_s26, [#allocation7], %s406_s21, %s406_s21, %s407_s22  }
  0x19   :  { %399 = dma.done.wait [#allocation4], 512  }
  0x1a   :  { %400 = vsyncadd [#allocation4], 4294966784 }
  0x1b   :  { %401 = dma.done.wait [#allocation7], 256  }
  0x1c   :  { %402 = vsyncadd [#allocation7], 4294967040  ;;  %v450_v0 = vld [vmem:[#allocation3 + $0x8] sm:$0xff]   ;;  %v273_v1 = vld [vmem:[%s528_s1] ss:$0 sm:$0xff]  ;;  %vm82_vm0 = vcmask 261120   ;;  %v108_v38 = vstv %s529_s2 }
  0x1d   :  { %v455_v2 = vld [vmem:[#allocation3] sm:$0xff]   ;;  %v284_v3 = vunpack.c.l.bf16 %v450_v0  ;;  %v285_v5 = vunpack.c.h.bf16 %v450_v0  ;;  %v461_v7 = vld [vmem:[#allocation3 + $0x10] sm:$0xff]   ;;  %v473_v14 = vld [vmem:[#allocation3 + $0x18] sm:$0xff]   ;;  %v409_v30 = vmov 0.0   ;;  %vm410_vm1 = vmmov 0   ;;  %s411_s7 = smov [#allocation8]  }
  0x1e   :  { %v280_v4 = vunpack.c.l.bf16 %v455_v2  ;;  %v281_v6 = vunpack.c.h.bf16 %v455_v2  ;;  %v289_v8 = vunpack.c.h.bf16 %v461_v7  ;;  %v288_v9 = vunpack.c.l.bf16 %v461_v7  ;;  %v317_v29 = vld [vmem:[#allocation6 + $0x8] sm:$0xff]   ;;  %300 = vmatprep.subr.bf16.mxu0 %v409_v30  ;;  %304 = vmatprep.mubr.msk.bf16.mxu0 %vm410_vm1, %v409_v30  ;;  %v318_v31 = vld [vmem:[#allocation6] sm:$0xff]   ;;  %s260_s8 = sshll.u32 %s411_s7, 4  ;;  %s261_s8 = int_to_ptr.vmem [resolvable:$true] %s260_s8 }
  0x1f   :  { %v76_v10 = vmul.f32 %v284_v3, %v273_v1  ;;  %v77_v12 = vmul.f32 %v285_v5, %v273_v1  ;;  %v293_v17 = vunpack.c.h.bf16 %v473_v14  ;;  %v292_v18 = vunpack.c.l.bf16 %v473_v14  ;;  %301 = vmatpush3.bf16.msra.mxu0 %v317_v29  ;;  %v274_v14 = vld [vmem:[%s531_s4] ss:$0 sm:$0xff]  ;;  %s379_s9 = scalar_lea.vmem %s261_s8, 256  ;;  %p384_p11 = scmp.lt.s32.totalorder %s261_s8, %s261_s8 }
  0x20   :  { %v74_v11 = vmul.f32 %v280_v4, %v273_v1  ;;  %v75_v13 = vmul.f32 %v281_v6, %v273_v1  ;;  %v79_v21 = vmul.f32 %v289_v8, %v273_v1  ;;  %v78_v22 = vmul.f32 %v288_v9, %v273_v1  ;;  %302 = vmatprep.subr.bf16.mxu0 %v409_v30  ;;  %p380_p10 = scmp.ne.s32.totalorder %s261_s8, %s379_s9  ;;  %p385_p12 = scmp.lt.s32.totalorder %s379_s9, %s379_s9 }
  0x21   :  { %v89_v15 = vsel %vm82_vm0, %v76_v10, 0.0  ;;  %v92_v19 = vsel %vm82_vm0, %v77_v12, 0.0  ;;  %v81_v25 = vmul.f32 %v293_v17, %v273_v1  ;;  %v80_v26 = vmul.f32 %v292_v18, %v273_v1 }
  0x22   :  { %v83_v16 = vsel %vm82_vm0, %v74_v11, 0.0  ;;  %90 = vadd.xlane.f32.xlu1 %v89_v15  ;;  %v86_v20 = vsel %vm82_vm0, %v75_v13, 0.0  ;;  %v98_v23 = vsel %vm82_vm0, %v79_v21, 0.0  ;;  %v95_v24 = vsel %vm82_vm0, %v78_v22, 0.0  ;;  %p386_p13 = por %p385_p12, %p384_p11 }
  0x23   :  { %84 = vadd.xlane.f32.xlu0 %v83_v16  ;;  %v104_v27 = vsel %vm82_vm0, %v81_v25, 0.0  ;;  %v101_v28 = vsel %vm82_vm0, %v80_v26, 0.0  ;;  %303 = vmatpush3.bf16.msra.mxu0 %v318_v31 }
  0x24   :  { %p387_p0 = pnand %p386_p13, %p380_p10 }
  0x26   :  { %93 = vadd.xlane.f32.xlu1 %v92_v19 }
  0x27   :  { %87 = vadd.xlane.f32.xlu0 %v86_v20 }
  0x2a   :  { %99 = vadd.xlane.f32.xlu1 %v98_v23 }
  0x2b   :  { %96 = vadd.xlane.f32.xlu0 %v95_v24 }
  0x2e   :  { %105 = vadd.xlane.f32.xlu1 %v104_v27 }
  0x2f   :  { %102 = vadd.xlane.f32.xlu0 %v101_v28 }
  0xab   :  { %v91_v32 = vpop.xlane.xlu1 %90 }
  0xac   :  { %v85_v33 = vpop.xlane.xlu0 %84  ;;  %v111_v41 = vadd.f32 %v108_v38, %v91_v32 }
  0xad   :  { %v109_v42 = vadd.f32 %v108_v38, %v85_v33 }
  0xaf   :  { %v94_v34 = vpop.xlane.xlu1 %93 }
  0xb0   :  { %v88_v35 = vpop.xlane.xlu0 %87  ;;  %v112_v45 = vadd.f32 %v108_v38, %v94_v34 }
  0xb1   :  { %v110_v46 = vadd.f32 %v108_v38, %v88_v35 }
  0xb3   :  { %v100_v36 = vpop.xlane.xlu1 %99 }
  0xb4   :  { %v97_v37 = vpop.xlane.xlu0 %96  ;;  %v114_v39 = vadd.f32 %v108_v38, %v100_v36 }
  0xb5   :  { %v113_v40 = vadd.f32 %v108_v38, %v97_v37 }
  0xb6   :  { %v120_v49 = vmax.f32 %v110_v46, %v114_v39 }
  0xb7   :  { %v106_v43 = vpop.xlane.xlu1 %105  ;;  %v117_v50 = vmax.f32 %v109_v42, %v113_v40 }
  0xb8   :  { %v103_v44 = vpop.xlane.xlu0 %102  ;;  %v116_v47 = vadd.f32 %v108_v38, %v106_v43 }
  0xb9   :  { %v115_v48 = vadd.f32 %v108_v38, %v103_v44 }
  0xba   :  { %v121_v51 = vmax.f32 %v112_v45, %v116_v47 }
  0xbb   :  { %v118_v52 = vmax.f32 %v111_v41, %v115_v48 }
  0xbc   :  { %v122_v53 = vmax.f32 %v120_v49, %v121_v51 }
  0xbd   :  { %v119_v54 = vmax.f32 %v117_v50, %v118_v52 }
  0xbe   :  { %v124_v55 = vsub.f32 %v110_v46, %v122_v53  ;;  %v126_v56 = vsub.f32 %v112_v45, %v122_v53  ;;  %v128_v57 = vsub.f32 %v114_v39, %v122_v53  ;;  %v130_v58 = vsub.f32 %v116_v47, %v122_v53 }
  0xbf   :  { %v123_v59 = vsub.f32 %v109_v42, %v119_v54  ;;  %v125_v60 = vsub.f32 %v111_v41, %v119_v54  ;;  %v127_v10 = vsub.f32 %v113_v40, %v119_v54  ;;  %v129_v12 = vsub.f32 %v115_v48, %v119_v54 }
  0xc0   :  { %v133_v61 = vmul.f32 1.442695, %v124_v55  ;;  %v137_v62 = vmul.f32 1.442695, %v126_v56  ;;  %v141_v63 = vmul.f32 1.442695, %v128_v57 }
  0xc1   :  { %v145_v1 = vmul.f32 1.442695, %v130_v58  ;;  %v131_v11 = vmul.f32 1.442695, %v123_v59  ;;  %v135_v13 = vmul.f32 1.442695, %v125_v60 }
  0xc2   :  { %319 = vpow2.f32 %v133_v61  ;;  %v139_v15 = vmul.f32 1.442695, %v127_v10  ;;  %v143_v16 = vmul.f32 1.442695, %v129_v12 }
  0xc3   :  { %321 = vpow2.f32 %v137_v62 }
  0xc4   :  { %323 = vpow2.f32 %v141_v63 }
  0xc5   :  { %325 = vpow2.f32 %v145_v1 }
  0xc6   :  { %327 = vpow2.f32 %v131_v11 }
  0xc7   :  { %329 = vpow2.f32 %v135_v13 }
  0xc8   :  { %331 = vpow2.f32 %v139_v15 }
  0xc9   :  { %333 = vpow2.f32 %v143_v16 }
  0xcf   :  { %v320_v19 = vpop.eup %319 }
  0xd0   :  { %v322_v20 = vpop.eup %321 }
  0xd1   :  { %v324_v21 = vpop.eup %323  ;;  %v150_v22 = vadd.f32 %v322_v20, %v320_v19 }
  0xd2   :  { %v326_v23 = vpop.eup %325 }
  0xd3   :  { %v328_v24 = vpop.eup %327  ;;  %v151_v25 = vadd.f32 %v324_v21, %v150_v22 }
  0xd4   :  { %v330_v26 = vpop.eup %329 }
  0xd5   :  { %v152_v27 = vadd.f32 %v326_v23, %v151_v25  ;;  %v147_v28 = vadd.f32 %v330_v26, %v328_v24  ;;  %v332_v29 = vpop.eup %331 }
  0xd6   :  { %v334_v31 = vpop.eup %333 }
  0xd7   :  { %335 = vrcp.f32 %v152_v27  ;;  %v148_v30 = vadd.f32 %v332_v29, %v147_v28 }
  0xd9   :  { %v149_v32 = vadd.f32 %v334_v31, %v148_v30 }
  0xdb   :  { %337 = vrcp.f32 %v149_v32 }
  0xe4   :  { %v336_v33 = vpop.eup %335 }
  0xe5   :  { %v156_v34 = vmul.f32 %v336_v33, %v320_v19  ;;  %v158_v35 = vmul.f32 %v336_v33, %v322_v20  ;;  %v160_v36 = vmul.f32 %v336_v33, %v324_v21  ;;  %v162_v37 = vmul.f32 %v336_v33, %v326_v23 }
  0xe7   :  { %v164_v38 = vmul.f32 %v281_v6, %v156_v34  ;;  %v166_v39 = vmul.f32 %v285_v5, %v158_v35  ;;  %v168_v41 = vmul.f32 %v289_v8, %v160_v36  ;;  %v170_v8 = vmul.f32 %v293_v17, %v162_v37 }
  0xe8   :  { %v338_v40 = vpop.eup %337 }
  0xe9   :  { %v155_v42 = vmul.f32 %v338_v40, %v328_v24  ;;  %v157_v43 = vmul.f32 %v338_v40, %v330_v26  ;;  %v159_v44 = vmul.f32 %v338_v40, %v332_v29  ;;  %v161_v45 = vmul.f32 %v338_v40, %v334_v31 }
  0xea   :  { %v178_v46 = vsel %vm82_vm0, %v164_v38, 0.0  ;;  %v179_v47 = vsel %vm82_vm0, %v166_v39, 0.0  ;;  %v181_v2 = vsel %vm82_vm0, %v168_v41, 0.0 }
  0xeb   :  { %v163_v48 = vmul.f32 %v280_v4, %v155_v42  ;;  %v165_v6 = vmul.f32 %v284_v3, %v157_v43  ;;  %v167_v5 = vmul.f32 %v288_v9, %v159_v44  ;;  %v180_v49 = vadd.f32 %v179_v47, %v178_v46 }
  0xec   :  { %v169_v50 = vmul.f32 %v292_v18, %v161_v45  ;;  %v183_v3 = vsel %vm82_vm0, %v170_v8, 0.0 }
  0xed   :  { %v171_v51 = vsel %vm82_vm0, %v163_v48, 0.0  ;;  %v172_v52 = vsel %vm82_vm0, %v165_v6, 0.0  ;;  %v182_v53 = vadd.f32 %v181_v2, %v180_v49  ;;  %v174_v0 = vsel %vm82_vm0, %v167_v5, 0.0 }
  0xee   :  { %v173_v4 = vadd.f32 %v172_v52, %v171_v51  ;;  %v176_v17 = vsel %vm82_vm0, %v169_v50, 0.0 }
  0xef   :  { %v184_v9 = vadd.f32 %v183_v3, %v182_v53 }
  0xf0   :  { %v175_v7 = vadd.f32 %v174_v0, %v173_v4 }
  0xf2   :  { %v177_v54 = vadd.f32 %v176_v17, %v175_v7 }
  0xf4   :  { %v185_v55 = vpack.c.bf16 %v184_v9, %v177_v54 }
  0xf6   :  { %305 = vmatmul.mubr.msk.bf16.vlgmr.msra.gmra.mxu0 %vm82_vm0, %v185_v55 }
 0x1b6   :  { %v246_v18 = vpop.f32.mrf.mxu0 }
 0x1b7   :  { %v247_v56 = vadd.f32 %v274_v14, %v246_v18 }
 0x1b8   :  { %v306_v57 = vpop.f32.mrf.mxu0 }
 0x1b9   :  { %253 = vst [vmem:[#allocation8] sm:$0xff] %v247_v56 }
 0x1ba   :  { %v249_v58 = vpop.f32.mrf.mxu0 }
 0x1bb   :  { %v250_v59 = vadd.f32 %v274_v14, %v249_v58 }
 0x1bc   :  { %v307_v60 = vpop.f32.mrf.mxu0 }
 0x1bd   :  { %254 = vst [vmem:[#allocation8 + $0x8] sm:$0xff] %v250_v59 }
 0x1be   :  { %390 = shalt.err (!%p387_p0)
}
 0x1bf   :  { %s412_s10 = smov 128   ;;  %s413_s4 = smov 8  }
 0x1c0   :  { %266 = dma.vmem_to_hbm [thread:$0]  %s261_s8, 256, %s532_s5, [#allocation5], %s412_s10, %s412_s10, %s413_s4  }
 0x1c1   :  { %403 = dma.done.wait [#allocation5], 256  }
 0x1c2   :  { %404 = vsyncadd [#allocation5], 4294967040 }
 0x1c3   :  { %270 = vsyncpa [#allocation4], 1 }
 0x1c4   :  { %271 = vsyncpa [#allocation7], 1 }
 0x1c5   :  { %272 = vsyncpa [#allocation5], 1 }

</bundles_post_ra>
